<compile_context>
chip_gen: v5e
topology: v5e:2x2
jax: 0.10.0
libtpu: 0.0.40
codegen_flags: <defaults>
</compile_context>

<pallas_src>
import functools

import jax
import jax.numpy as jnp
from jax.experimental import pallas as pl
from jax.experimental.pallas import tpu as pltpu


# ---------------------------------------------------------------------------
# Tiling configuration
# ---------------------------------------------------------------------------
_TM_MAX = 512            # target-row tile (review: 256 -> 512)
_TK_MAX = 2048           # source (reduction) tile (review: 512 -> 2048)
_TF_MAX = 1024           # f_in reduction tile for the projection kernels
_SUBLANE = 16            # bf16-safe sublane multiple
_LANE = 128              # lane width
# XW is kept fully VMEM-resident in the aggregation kernel when two copies of it
# (pipeline buffering) fit this budget; otherwise it is streamed per source block.
_RESIDENT_XW_BUDGET = 12 * 1024 * 1024
# Scoped VMEM limit: > v5e's 16 MiB default, <= v6e 128 MiB / v7x 64 MiB physical.
_VMEM_LIMIT = 48 * 1024 * 1024


def _round_up(x, m):
    return ((x + m - 1) // m) * m


def _cdiv(a, b):
    return (a + b - 1) // b


def _largest_aligned_divisor(total, align, cap):
    """Largest multiple of `align` that divides `total` and is <= cap."""
    best = align
    d = align
    while d <= min(total, cap):
        if total % d == 0:
            best = d
        d += align
    return best


def _pad2(x, rows, cols, dtype):
    x = x.astype(dtype)
    return jnp.pad(x, ((0, rows - x.shape[0]), (0, cols - x.shape[1])))


def _choose_target_tiling(n_tgt):
    """Target (output-row) tile: multiple of 16, capped, and sized so there are
    >= 2 tiles whenever possible (keeps v7x's second TensorCore busy)."""
    want = _round_up(max(_cdiv(n_tgt, 2), 1), _SUBLANE)
    tm = min(_TM_MAX, want)
    n_tgt_p = _round_up(max(n_tgt, 1), tm)
    return tm, n_tgt_p


def _choose_source_tiling(n_src):
    tk = min(_TK_MAX, _round_up(max(n_src, 1), _LANE))
    n_src_p = _round_up(max(n_src, 1), tk)
    return tk, n_src_p


# ---------------------------------------------------------------------------
# Kernels
# ---------------------------------------------------------------------------
def _linear_kernel(x_ref, w_ref, b_ref, o_ref, acc_ref):
    """o = x @ w + b, gridded over (row tiles, f_in blocks), f32 MXU accumulation."""
    k = pl.program_id(1)

    @pl.when(k == 0)
    def _():
        acc_ref[...] = jnp.zeros_like(acc_ref)

    acc_ref[...] += jnp.dot(x_ref[...], w_ref[...],
                            preferred_element_type=jnp.float32)

    @pl.when(k == pl.num_programs(1) - 1)
    def _():
        o_ref[...] = (acc_ref[...] + b_ref[0:1, :]).astype(o_ref.dtype)


def _linear_pallas(x, w, b, out_dtype, row_tile):
    """x: (rows_p, f_in_p) bf16, w: (f_in_p, f_out_p) bf16, b: (8, f_out_p) f32."""
    rows, f_in_p = x.shape
    f_out_p = w.shape[1]
    tf = f_in_p if f_in_p <= _TF_MAX else _largest_aligned_divisor(f_in_p, _LANE, _TF_MAX)

    cost = pl.CostEstimate(
        flops=2 * rows * f_in_p * f_out_p,
        transcendentals=0,
        bytes_accessed=(rows * f_in_p * 2 + f_in_p * f_out_p * 2
                        + 8 * f_out_p * 4
                        + rows * f_out_p * jnp.dtype(out_dtype).itemsize))

    return pl.pallas_call(
        _linear_kernel,
        out_shape=jax.ShapeDtypeStruct((rows, f_out_p), out_dtype),
        grid=(rows // row_tile, f_in_p // tf),
        in_specs=[pl.BlockSpec((row_tile, tf), lambda i, k: (i, k)),
                  pl.BlockSpec((tf, f_out_p), lambda i, k: (k, 0)),
                  pl.BlockSpec((8, f_out_p), lambda i, k: (0, 0))],
        out_specs=pl.BlockSpec((row_tile, f_out_p), lambda i, k: (i, 0)),
        scratch_shapes=[pltpu.VMEM((row_tile, f_out_p), jnp.float32)],
        compiler_params=pltpu.CompilerParams(
            dimension_semantics=("parallel", "arbitrary"),
            vmem_limit_bytes=_VMEM_LIMIT),
        cost_estimate=cost,
    )(x, w, b)


def _sage_aggregate_kernel(a_ref, xw_ref, xtwrb_ref, invdeg_ref, o_ref, acc_ref,
                           *, activation, out_dim, tk, resident_xw):
    k = pl.program_id(1)

    @pl.when(k == 0)
    def _():
        acc_ref[...] = jnp.zeros_like(acc_ref)

    if resident_xw:
        # XW is a single VMEM-resident block; slice the current k-panel in-kernel.
        start = pl.multiple_of(k * tk, _LANE)
        xw_blk = xw_ref[pl.ds(start, tk), :]
    else:
        xw_blk = xw_ref[...]

    # steady state: a single MXU accumulate  acc += A01[i, k] @ XW[k]
    acc_ref[...] += jnp.dot(a_ref[...], xw_blk,
                            preferred_element_type=jnp.float32)

    @pl.when(k == pl.num_programs(1) - 1)
    def _():
        # mean = f32 inv_deg * sum; root term (Xt @ Wr + b) precomputed in f32.
        h = acc_ref[...] * invdeg_ref[:, 0:1] + xtwrb_ref[...]

        if activation == "relu":
            h = jnp.maximum(h, 0.0)
        elif activation == "log_softmax":
            # mask padded lanes so they don't corrupt the normalization
            lane = jax.lax.broadcasted_iota(jnp.int32, h.shape, 1)
            valid = lane < out_dim
            hm = jnp.where(valid, h, -jnp.inf)
            m = jnp.max(hm, axis=-1, keepdims=True)
            e = jnp.where(valid, jnp.exp(hm - m), 0.0)
            h = (h - m) - jnp.log(jnp.sum(e, axis=-1, keepdims=True))
        elif activation == "sigmoid":
            h = 1.0 / (1.0 + jnp.exp(-h))
        # activation == "none": identity

        o_ref[...] = h.astype(o_ref.dtype)


def sage_conv_pallas(A01, inv_deg, X, Xt, Wl, bl, Wr, activation, out_dtype):
    """One SAGEConv layer (+ fused activation):
         out = act( inv_deg * (A01 @ (X @ Wl)) + Xt @ Wr + bl )."""
    n_tgt, n_src = A01.shape
    f_in, f_out = Wl.shape

    # lane-dense feature padding (multiples of 128)
    f_in_p = _round_up(f_in, _LANE)
    f_out_p = _round_up(f_out, _LANE)

    tm, n_tgt_p = _choose_target_tiling(n_tgt)
    tk, n_src_p = _choose_source_tiling(n_src)

    # bf16 MXU operands (accumulation stays f32); bias / inv_deg stay f32
    Ap = _pad2(A01, n_tgt_p, n_src_p, jnp.bfloat16)
    Xp = _pad2(X, n_src_p, f_in_p, jnp.bfloat16)
    Xtp = _pad2(Xt, n_tgt_p, f_in_p, jnp.bfloat16)
    Wlp = _pad2(Wl, f_in_p, f_out_p, jnp.bfloat16)
    Wrp = _pad2(Wr, f_in_p, f_out_p, jnp.bfloat16)
    blp = _pad2(bl.reshape(1, -1), 8, f_out_p, jnp.float32)
    zero_b = jnp.zeros((8, f_out_p), jnp.float32)
    invdeg_p = jnp.zeros((n_tgt_p, _LANE), jnp.float32).at[:n_tgt, 0].set(
        inv_deg.astype(jnp.float32))

    # 1) neighbour projection XW = X @ Wl (hoisted out of the aggregation loop)
    src_row_tile = tk if tk <= 512 else _largest_aligned_divisor(tk, _LANE, 512)
    xw = _linear_pallas(Xp, Wlp, zero_b, jnp.bfloat16, src_row_tile)

    # 2) root projection (+ bias) XtWrb = Xt @ Wr + bl, kept in f32
    xtwrb = _linear_pallas(Xtp, Wrp, blp, jnp.float32, tm)

    # 3) aggregation + finalize: out = act(inv_deg * (A01 @ XW) + XtWrb)
    resident_xw = 2 * n_src_p * f_out_p * 2 <= _RESIDENT_XW_BUDGET
    if resident_xw:
        xw_spec = pl.BlockSpec((n_src_p, f_out_p), lambda i, k: (0, 0))
    else:
        xw_spec = pl.BlockSpec((tk, f_out_p), lambda i, k: (k, 0))

    kernel = functools.partial(_sage_aggregate_kernel, activation=activation,
                               out_dim=f_out, tk=tk, resident_xw=resident_xw)
    n_transc = n_tgt_p * f_out_p if activation in ("log_softmax", "sigmoid") else 0
    cost = pl.CostEstimate(
        flops=2 * n_tgt_p * n_src_p * f_out_p,
        transcendentals=n_transc,
        bytes_accessed=(n_tgt_p * n_src_p * 2 + n_src_p * f_out_p * 2
                        + n_tgt_p * f_out_p * 4 + n_tgt_p * _LANE * 4
                        + n_tgt_p * f_out_p * jnp.dtype(out_dtype).itemsize))

    out = pl.pallas_call(
        kernel,
        out_shape=jax.ShapeDtypeStruct((n_tgt_p, f_out_p), out_dtype),
        grid=(n_tgt_p // tm, n_src_p // tk),
        in_specs=[pl.BlockSpec((tm, tk), lambda i, k: (i, k)),
                  xw_spec,
                  pl.BlockSpec((tm, f_out_p), lambda i, k: (i, 0)),
                  pl.BlockSpec((tm, _LANE), lambda i, k: (i, 0))],
        out_specs=pl.BlockSpec((tm, f_out_p), lambda i, k: (i, 0)),
        scratch_shapes=[pltpu.VMEM((tm, f_out_p), jnp.float32)],
        compiler_params=pltpu.CompilerParams(
            dimension_semantics=("parallel", "arbitrary"),
            vmem_limit_bytes=_VMEM_LIMIT),
        cost_estimate=cost,
    )(Ap, xw, xtwrb, invdeg_p)

    return out[:n_tgt, :f_out]


def mean_aggregation_inputs(edge_index, n_src, n_tgt):
    """Glue: exact 0/1 (edge-count) adjacency in bf16 + f32 1/deg vector.

    A is scattered directly at bf16 (small integer counts are exact in bf16 up to
    256 parallel edges), skipping the dense f32 intermediate; the mean
    normalisation 1/deg is applied later as an exact f32 per-row scale inside the
    aggregation kernel's finalize phase.
    """
    src, dst = edge_index[0], edge_index[1]
    deg = jax.ops.segment_sum(jnp.ones(src.shape, jnp.float32), dst,
                              num_segments=n_tgt)
    inv_deg = jnp.where(deg > 0.0, 1.0 / deg, 0.0)
    ones = jnp.ones(src.shape, jnp.bfloat16)
    A01 = jnp.zeros((n_tgt, n_src), jnp.bfloat16).at[dst, src].add(ones)
    return A01, inv_deg


def sage_forward(x, adjs, params, classification_type="multiclass"):
    """adjs: list of (edge_index, size) with size = (n_src, n_tgt)."""
    num_layers = len(adjs)
    for i, (edge_index, size) in enumerate(adjs):
        n_src, n_tgt = size
        x_target = x[:n_tgt]
        A01, inv_deg = mean_aggregation_inputs(edge_index, n_src, n_tgt)
        Wl, bl, Wr = params[i]
        last = i == num_layers - 1
        if last:
            act = "sigmoid" if classification_type == "multilabel" else "log_softmax"
            out_dtype = jnp.float32
        else:
            act = "relu"
            out_dtype = jnp.bfloat16  # hidden activations kept bf16 between layers
        x = sage_conv_pallas(A01, inv_deg, x, x_target, Wl, bl, Wr, act, out_dtype)
        # TODO(synk): F.dropout(p=0.5, training=...) after non-final layers is
        # identity here (eval semantics).
    return x


def init_linear(key, fan_in, fan_out):
    scale = 1.0 / jnp.sqrt(jnp.float32(fan_in))
    return jax.random.uniform(key, (fan_in, fan_out), jnp.float32, -scale, scale)


if __name__ == "__main__":
    # Small synthetic neighbor-sampled bipartite graphs.
    in_channels, hidden_channels, out_channels = 16, 32, 8
    n0, n1, n2 = 24, 12, 4          # sampled node counts per hop (batch size = 4)
    fanout = 3                       # neighbors sampled per target node

    root = jax.random.PRNGKey(0)
    k_x, k_e0, k_e1, k_w = jax.random.split(root, 4)

    # node features for the outermost sampled node set
    x = jax.random.normal(k_x, (n0, in_channels), jnp.float32)

    # hop 0: edges from sources in [0, n0) to targets in [0, n1)
    src0 = jax.random.randint(k_e0, (n1 * fanout,), 0, n0)
    dst0 = jnp.repeat(jnp.arange(n1), fanout)
    edge_index0 = jnp.stack([src0, dst0])

    # hop 1: edges from sources in [0, n1) to targets in [0, n2)
    src1 = jax.random.randint(k_e1, (n2 * fanout,), 0, n1)
    dst1 = jnp.repeat(jnp.arange(n2), fanout)
    edge_index1 = jnp.stack([src1, dst1])

    adjs = [(edge_index0, (n0, n1)), (edge_index1, (n1, n2))]

    # deterministic parameter init (PyG SAGEConv: lin_l has bias, lin_r has none)
    kw = jax.random.split(k_w, 4)
    params = [
        (init_linear(kw[0], in_channels, hidden_channels),      # W_l layer 0
         jnp.zeros((hidden_channels,), jnp.float32),             # b_l layer 0
         init_linear(kw[1], in_channels, hidden_channels)),      # W_r layer 0
        (init_linear(kw[2], hidden_channels, out_channels),      # W_l layer 1
         jnp.zeros((out_channels,), jnp.float32),                # b_l layer 1
         init_linear(kw[3], hidden_channels, out_channels)),     # W_r layer 1
    ]

    out = sage_forward(x, adjs, params, classification_type="multiclass")
    out = jax.block_until_ready(out)

    assert out.shape == (n2, out_channels)
    # log_softmax rows should exponentiate-sum to ~1
    assert bool(jnp.allclose(jnp.sum(jnp.exp(out), axis=-1), 1.0, atol=1e-4))
    print("KERNEL_OK")
</pallas_src>

<mosaic_0001>
module attributes {stable_mosaic.version = 11 : i64} {
  func.func @_linear_kernel(%arg0: i32, %arg1: i32, %arg2: memref<128x128xbf16, #tpu.memory_space<vmem>>, %arg3: memref<128x128xbf16, #tpu.memory_space<vmem>>, %arg4: memref<8x128xf32, #tpu.memory_space<vmem>>, %arg5: memref<128x128xbf16, #tpu.memory_space<vmem>>, %arg6: memref<128x128xf32, #tpu.memory_space<vmem>>) attributes {dimension_semantics = [#tpu.dimension_semantics<parallel>, #tpu.dimension_semantics<arbitrary>], iteration_bounds = array<i64: 1, 1>, scalar_prefetch = 0 : i64, scratch_operands = 1 : i64, tpu.core_type = #tpu.core_type<tc>, window_params = [{transform_indices = @transform_0, window_bounds = array<i64: 128, 128>}, {transform_indices = @transform_1, window_bounds = array<i64: 128, 128>}, {pipeline_mode = #tpu.pipeline_mode<synchronous>, transform_indices = @transform_2, window_bounds = array<i64: 8, 128>}, {transform_indices = @transform_3, window_bounds = array<i64: 128, 128>}]} {
    %c0_i32 = arith.constant 0 : i32
    %0 = arith.cmpi eq, %arg1, %c0_i32 : i32
    %1 = arith.extui %0 : i1 to i32
    %c0_i32_0 = arith.constant 0 : i32
    %2 = arith.cmpi ne, %1, %c0_i32_0 : i32
    scf.if %2 {
      %cst_10 = arith.constant 0.000000e+00 : f32
      %12 = vector.broadcast %cst_10 : f32 to vector<128x128xf32>
      %c0_11 = arith.constant 0 : index
      %c0_12 = arith.constant 0 : index
      %13 = vector.load %arg6[%c0_11, %c0_12] : memref<128x128xf32, #tpu.memory_space<vmem>>, vector<128x128xf32>
      tpu.vector_store %arg6[%c0_11, %c0_12], %12 {strides = array<i32>} : memref<128x128xf32, #tpu.memory_space<vmem>>, vector<128x128xf32>,
    } else {
    }
    %c0 = arith.constant 0 : index
    %c0_1 = arith.constant 0 : index
    %3 = vector.load %arg6[%c0, %c0_1] : memref<128x128xf32, #tpu.memory_space<vmem>>, vector<128x128xf32>
    %c0_2 = arith.constant 0 : index
    %c0_3 = arith.constant 0 : index
    %4 = vector.load %arg2[%c0_2, %c0_3] : memref<128x128xbf16, #tpu.memory_space<vmem>>, vector<128x128xbf16>
    %c0_4 = arith.constant 0 : index
    %c0_5 = arith.constant 0 : index
    %5 = vector.load %arg3[%c0_4, %c0_5] : memref<128x128xbf16, #tpu.memory_space<vmem>>, vector<128x128xbf16>
    %cst = arith.constant dense<0.000000e+00> : vector<128x128xf32>
    %6 = tpu.matmul %4, %5, %cst {dimension_numbers = #tpu.dot_dimension_numbers<[1], [0], [0], [1], [0, 0, 1, 1], [], []>} : vector<128x128xbf16>, vector<128x128xbf16>, vector<128x128xf32> -> vector<128x128xf32>
    %7 = arith.addf %3, %6 : vector<128x128xf32>
    %c0_6 = arith.constant 0 : index
    %c0_7 = arith.constant 0 : index
    %8 = vector.load %arg6[%c0_6, %c0_7] : memref<128x128xf32, #tpu.memory_space<vmem>>, vector<128x128xf32>
    tpu.vector_store %arg6[%c0_6, %c0_7], %7 {strides = array<i32>} : memref<128x128xf32, #tpu.memory_space<vmem>>, vector<128x128xf32>,
    %c0_i32_8 = arith.constant 0 : i32
    %9 = arith.cmpi eq, %arg1, %c0_i32_8 : i32
    %10 = arith.extui %9 : i1 to i32
    %c0_i32_9 = arith.constant 0 : i32
    %11 = arith.cmpi ne, %10, %c0_i32_9 : i32
    scf.if %11 {
      %c0_10 = arith.constant 0 : index
      %c0_11 = arith.constant 0 : index
      %12 = vector.load %arg6[%c0_10, %c0_11] : memref<128x128xf32, #tpu.memory_space<vmem>>, vector<128x128xf32>
      %c0_12 = arith.constant 0 : index
      %c0_13 = arith.constant 0 : index
      %13 = vector.load %arg4[%c0_12, %c0_13] : memref<8x128xf32, #tpu.memory_space<vmem>>, vector<1x128xf32>
      %14 = vector.broadcast %13 : vector<1x128xf32> to vector<128x128xf32>
      %15 = arith.addf %12, %14 : vector<128x128xf32>
      %16 = arith.truncf %15 : vector<128x128xf32> to vector<128x128xbf16>
      %c0_14 = arith.constant 0 : index
      %c0_15 = arith.constant 0 : index
      %17 = vector.load %arg5[%c0_14, %c0_15] : memref<128x128xbf16, #tpu.memory_space<vmem>>, vector<128x128xbf16>
      tpu.vector_store %arg5[%c0_14, %c0_15], %16 {strides = array<i32>} : memref<128x128xbf16, #tpu.memory_space<vmem>>, vector<128x128xbf16>,
    } else {
    }
    return
  }
  func.func @transform_0(%arg0: i32, %arg1: i32) -> (i32, i32) {
    %c0_i32 = arith.constant 0 : i32
    return %arg0, %arg1 : i32, i32
  }
  func.func @transform_1(%arg0: i32, %arg1: i32) -> (i32, i32) {
    %c0_i32 = arith.constant 0 : i32
    %c0_i32_0 = arith.constant 0 : i32
    return %arg1, %c0_i32 : i32, i32
  }
  func.func @transform_2(%arg0: i32, %arg1: i32) -> (i32, i32) {
    %c0_i32 = arith.constant 0 : i32
    %c0_i32_0 = arith.constant 0 : i32
    %c0_i32_1 = arith.constant 0 : i32
    return %c0_i32, %c0_i32_0 : i32, i32
  }
  func.func @transform_3(%arg0: i32, %arg1: i32) -> (i32, i32) {
    %c0_i32 = arith.constant 0 : i32
    %c0_i32_0 = arith.constant 0 : i32
    return %arg0, %c0_i32 : i32, i32
  }
}

</mosaic_0001>

<bundles_post_ra>
// kernel: tpu_custom_call.1
= control target key start
LH: loop header
LB: loop body
LE: loop exit
PB: predicated region body
PF: predicated region fallthrough
CT: control target
= control target key end

     0   :  { %8 = vsyncpa [#allocation4], 0  ;;  %s701_s0 = inlined_call_operand.hbm [shape: bf16[128,128], index: 0, kind: input, shape index: {}]   ;;  %s702_s1 = inlined_call_operand.hbm [shape: bf16[128,128], index: 1, kind: input, shape index: {}]   ;;  %s703_s2 = inlined_call_operand.hbm [shape: f32[8,128], index: 2, kind: input, shape index: {}]   ;;  %s704_s3 = inlined_call_operand.hbm [shape: bf16[128,128], index: 3, kind: output, shape index: {}]  }
   0x1   :  { %9 = vsyncpa [#allocation7], 0 }
   0x2   :  { %10 = vsyncpa [#allocation5], 0  ;;  %s28_s14 = sshll.u32 %s702_s1, 4  ;;  %s654_s15 = smov [#allocation6]   ;;  %s29_s14 = int_to_ptr.hbm [resolvable:$true] %s28_s14 }
   0x3   :  { %s30_s16 = sshll.u32 %s654_s15, 4  ;;  %s15_s19 = sshll.u32 %s701_s0, 4  ;;  %s31_s16 = int_to_ptr.vmem [resolvable:$true] %s30_s16  ;;  %s16_s19 = int_to_ptr.hbm [resolvable:$true] %s15_s19 }
   0x4   :  { %s655_s20 = smov 64   ;;  %s656_s21 = smov 4  }
   0x5   :  { %36 = dma.hbm_to_vmem [thread:$0]  %s29_s14, 1024, %s31_s16, [#allocation7], %s655_s20, %s655_s20, %s656_s21  }
   0x6   :  { %s657_s22 = smov [#allocation3]   ;;  %s42_s1 = sshll.u32 %s703_s2, 4  ;;  %s43_s1 = int_to_ptr.hbm [resolvable:$true] %s42_s1 }
   0x7   :  { %s17_s23 = sshll.u32 %s657_s22, 4  ;;  %s658_s0 = smov [#allocation8]   ;;  %s18_s23 = int_to_ptr.vmem [resolvable:$true] %s17_s23 }
   0x8   :  { %23 = dma.hbm_to_vmem [thread:$0]  %s16_s19, 1024, %s18_s23, [#allocation4], %s655_s20, %s655_s20, %s656_s21  }
   0x9   :  { %s44_s26 = sshll.u32 %s658_s0, 4  ;;  %s45_s26 = int_to_ptr.vmem [resolvable:$true] %s44_s26 }
   0xa   :  { %47 = dma.hbm_to_vmem [thread:$0]  %s43_s1, 128, %s45_s26, [#allocation7]  }
   0xb   :  { %648 = dma.done.wait [#allocation4], 1024  }
   0xc   :  { %649 = vsyncadd [#allocation4], 4294966272 }
   0xd   :  { %650 = dma.done.wait [#allocation7], 1152  }
   0xe   :  { %651 = vsyncadd [#allocation7], 4294966144  ;;  %v473_v0 = vld [vmem:[#allocation6 + $0x38] sm:$0xff]  ;;  %v472_v1 = vld [vmem:[#allocation6 + $0x30] sm:$0xff]  ;;  %s659_s2 = smov [#allocation9]   ;;  %s380_s30 = sshll.u32 %s704_s3, 4  ;;  %s381_s30 = int_to_ptr.hbm [resolvable:$true] %s380_s30 }
   0xf   :  { %224 = vmatpush.bf16.msra.mxu0 %v473_v0  ;;  %521 = vmatpush.bf16.msra.mxu1 %v473_v0  ;;  %v471_v2 = vld [vmem:[#allocation6 + $0x28] sm:$0xff]  ;;  %v470_v3 = vld [vmem:[#allocation6 + $0x20] sm:$0xff]  ;;  %v469_v4 = vld [vmem:[#allocation6 + $0x18] sm:$0xff]  ;;  %s378_s27 = sshll.u32 %s659_s2, 4  ;;  %s379_s27 = int_to_ptr.vmem [resolvable:$true] %s378_s27 }
  0x10   :  { %522 = vmatpush.bf16.msra.mxu2 %v473_v0  ;;  %523 = vmatpush.bf16.msra.mxu3 %v473_v0  ;;  %v468_v5 = vld [vmem:[#allocation6 + $0x10] sm:$0xff]  ;;  %v467_v6 = vld [vmem:[#allocation6 + $0x8] sm:$0xff]  ;;  %v466_v7 = vld [vmem:[#allocation6] sm:$0xff] }
  0x11   :  { %v458_v8 = vld [vmem:[#allocation3] sm:$0xff]  ;;  %v460_v9 = vld [vmem:[#allocation3 + $0x10] sm:$0xff]  ;;  %v459_v12 = vld [vmem:[#allocation3 + $0x8] sm:$0xff] }
  0x12   :  { %v462_v10 = vld [vmem:[#allocation3 + $0x20] sm:$0xff]  ;;  %v464_v11 = vld [vmem:[#allocation3 + $0x30] sm:$0xff]  ;;  %v461_v13 = vld [vmem:[#allocation3 + $0x18] sm:$0xff] }
  0x13   :  { %225 = vmatpush.bf16.msra.mxu0 %v472_v1  ;;  %524 = vmatpush.bf16.msra.mxu1 %v472_v1  ;;  %v463_v14 = vld [vmem:[#allocation3 + $0x28] sm:$0xff]  ;;  %v465_v15 = vld [vmem:[#allocation3 + $0x38] sm:$0xff]  ;;  %v551_v18 = vld [vmem:[#allocation8] ss:$0 sm:$0xff] }
  0x14   :  { %525 = vmatpush.bf16.msra.mxu2 %v472_v1  ;;  %526 = vmatpush.bf16.msra.mxu3 %v472_v1 }
  0x17   :  { %226 = vmatpush.bf16.msra.mxu0 %v471_v2  ;;  %527 = vmatpush.bf16.msra.mxu1 %v471_v2 }
  0x18   :  { %528 = vmatpush.bf16.msra.mxu2 %v471_v2  ;;  %529 = vmatpush.bf16.msra.mxu3 %v471_v2 }
  0x1b   :  { %227 = vmatpush.bf16.msra.mxu0 %v470_v3  ;;  %530 = vmatpush.bf16.msra.mxu1 %v470_v3 }
  0x1c   :  { %531 = vmatpush.bf16.msra.mxu2 %v470_v3  ;;  %532 = vmatpush.bf16.msra.mxu3 %v470_v3 }
  0x1f   :  { %228 = vmatpush.bf16.msra.mxu0 %v469_v4  ;;  %533 = vmatpush.bf16.msra.mxu1 %v469_v4 }
  0x20   :  { %534 = vmatpush.bf16.msra.mxu2 %v469_v4  ;;  %535 = vmatpush.bf16.msra.mxu3 %v469_v4 }
  0x23   :  { %229 = vmatpush.bf16.msra.mxu0 %v468_v5  ;;  %536 = vmatpush.bf16.msra.mxu1 %v468_v5 }
  0x24   :  { %537 = vmatpush.bf16.msra.mxu2 %v468_v5  ;;  %538 = vmatpush.bf16.msra.mxu3 %v468_v5 }
  0x27   :  { %230 = vmatpush.bf16.msra.mxu0 %v467_v6  ;;  %539 = vmatpush.bf16.msra.mxu1 %v467_v6 }
  0x28   :  { %540 = vmatpush.bf16.msra.mxu2 %v467_v6  ;;  %541 = vmatpush.bf16.msra.mxu3 %v467_v6 }
  0x2b   :  { %231 = vmatpush.bf16.msra.mxu0 %v466_v7  ;;  %542 = vmatpush.bf16.msra.mxu1 %v466_v7 }
  0x2c   :  { %543 = vmatpush.bf16.msra.mxu2 %v466_v7  ;;  %544 = vmatpush.bf16.msra.mxu3 %v466_v7 }
  0x2e   :  { %232 = vmatmul.bf16.vlgmr.msra.gmra.mxu0 %v458_v8  ;;  %242 = vmatmul.bf16.vlgmr.msra.gmra.mxu1 %v460_v9 }
  0x2f   :  { %252 = vmatmul.bf16.vlgmr.msra.gmra.mxu2 %v462_v10  ;;  %262 = vmatmul.bf16.vlgmr.msra.gmra.mxu3 %v464_v11 }
  0x3e   :  { %237 = vmatmul.bf16.gmra.mxu0 %v459_v12  ;;  %247 = vmatmul.bf16.gmra.mxu1 %v461_v13 }
  0x3f   :  { %257 = vmatmul.bf16.gmra.mxu2 %v463_v14  ;;  %267 = vmatmul.bf16.gmra.mxu3 %v465_v15 }
  0xab   :  { %v233_v16 = vpop.f32.mrf.mxu0  ;;  %v243_v17 = vpop.f32.mrf.mxu1 }
  0xac   :  { %v326_v23 = vadd.f32 %v551_v18, %v233_v16  ;;  %v330_v24 = vadd.f32 %v551_v18, %v243_v17 }
  0xb2   :  { %v253_v19 = vpop.f32.mrf.mxu2  ;;  %v263_v20 = vpop.f32.mrf.mxu3 }
  0xb3   :  { %v235_v21 = vpop.f32.mrf.mxu0  ;;  %v245_v22 = vpop.f32.mrf.mxu1  ;;  %v334_v31 = vadd.f32 %v551_v18, %v253_v19  ;;  %v338_v32 = vadd.f32 %v551_v18, %v263_v20 }
  0xb4   :  { %v327_v25 = vadd.f32 %v551_v18, %v235_v21  ;;  %v331_v26 = vadd.f32 %v551_v18, %v245_v22 }
  0xb6   :  { %v477_v27 = vpack.c.bf16 %v327_v25, %v326_v23  ;;  %v487_v28 = vpack.c.bf16 %v331_v26, %v330_v24 }
  0xb8   :  { %478 = vst [vmem:[#allocation9] sm:$0xff] %v477_v27  }
  0xb9   :  { %515 = vst [vmem:[#allocation9 + $0x10] sm:$0xff] %v487_v28  }
  0xba   :  { %v255_v29 = vpop.f32.mrf.mxu2  ;;  %v265_v30 = vpop.f32.mrf.mxu3 }
  0xbb   :  { %v335_v33 = vadd.f32 %v551_v18, %v255_v29  ;;  %v339_v34 = vadd.f32 %v551_v18, %v265_v30  ;;  %v238_v35 = vpop.f32.mrf.mxu0  ;;  %v248_v36 = vpop.f32.mrf.mxu1 }
  0xbc   :  { %v328_v43 = vadd.f32 %v551_v18, %v238_v35  ;;  %v332_v44 = vadd.f32 %v551_v18, %v248_v36 }
  0xbd   :  { %v497_v37 = vpack.c.bf16 %v335_v33, %v334_v31  ;;  %v507_v38 = vpack.c.bf16 %v339_v34, %v338_v32 }
  0xbf   :  { %517 = vst [vmem:[#allocation9 + $0x20] sm:$0xff] %v497_v37  }
  0xc0   :  { %519 = vst [vmem:[#allocation9 + $0x30] sm:$0xff] %v507_v38  }
  0xc2   :  { %v258_v39 = vpop.f32.mrf.mxu2  ;;  %v268_v40 = vpop.f32.mrf.mxu3 }
  0xc3   :  { %v240_v41 = vpop.f32.mrf.mxu0  ;;  %v250_v42 = vpop.f32.mrf.mxu1  ;;  %v336_v51 = vadd.f32 %v551_v18, %v258_v39  ;;  %v340_v52 = vadd.f32 %v551_v18, %v268_v40 }
  0xc4   :  { %v329_v45 = vadd.f32 %v551_v18, %v240_v41  ;;  %v333_v46 = vadd.f32 %v551_v18, %v250_v42 }
  0xc6   :  { %v482_v47 = vpack.c.bf16 %v329_v45, %v328_v43  ;;  %v492_v48 = vpack.c.bf16 %v333_v46, %v332_v44 }
  0xc8   :  { %514 = vst [vmem:[#allocation9 + $0x8] sm:$0xff] %v482_v47  }
  0xc9   :  { %516 = vst [vmem:[#allocation9 + $0x18] sm:$0xff] %v492_v48  }
  0xca   :  { %v260_v49 = vpop.f32.mrf.mxu2  ;;  %v270_v50 = vpop.f32.mrf.mxu3 }
  0xcb   :  { %v337_v53 = vadd.f32 %v551_v18, %v260_v49  ;;  %v341_v54 = vadd.f32 %v551_v18, %v270_v50 }
  0xcd   :  { %v502_v55 = vpack.c.bf16 %v337_v53, %v336_v51  ;;  %v512_v56 = vpack.c.bf16 %v341_v54, %v340_v52 }
  0xcf   :  { %518 = vst [vmem:[#allocation9 + $0x28] sm:$0xff] %v502_v55  }
  0xd0   :  { %520 = vst [vmem:[#allocation9 + $0x38] sm:$0xff] %v512_v56  }
  0xd1   :  { %386 = dma.vmem_to_hbm [thread:$0]  %s379_s27, 1024, %s381_s30, [#allocation5], %s655_s20, %s655_s20, %s656_s21  }
  0xd2   :  { %652 = dma.done.wait [#allocation5], 1024  }
  0xd3   :  { %653 = vsyncadd [#allocation5], 4294966272 }
  0xd4   :  { %391 = vsyncpa [#allocation4], 1 }
  0xd5   :  { %392 = vsyncpa [#allocation7], 1 }
  0xd6   :  { %393 = vsyncpa [#allocation5], 1 }

</bundles_post_ra>
